<compile_context>
chip_gen: v5e
topology: v5e:2x2
jax: 0.10.0
libtpu: 0.0.40
codegen_flags: <defaults>
</compile_context>

<pallas_src>
import jax
import jax.numpy as jnp
from jax import lax
from jax.experimental import pallas as pl
from jax.experimental.pallas import tpu as pltpu

LANE = 128     # feature / contraction axes padded to one lane tile
SUBLANE = 8
BN_EPS = 1e-5


def _round_up(x, m):
    return (x + m - 1) // m * m


def _pad2d(a, rows, cols):
    a = jnp.asarray(a, jnp.float32)
    if a.ndim == 1:
        a = a[None, :]
    out = jnp.zeros((rows, cols), jnp.float32)
    return out.at[:a.shape[0], :a.shape[1]].set(a)


# ------------------------- fused forward kernel --------------------------- #
def _make_fused_kernel(n_gcn, n_mlp, node_count, eps):
    inv_count = 1.0 / float(node_count)
    # Row layout of the stacked bias/affine tensor.
    b_gcn_off = 0
    b_mlp_off = n_gcn
    gamma_off = n_gcn + n_mlp
    beta_off = gamma_off + (n_mlp - 1)

    def kernel(x_ref, adj_ref, pool_ref, mask_ref, w_ref, vec_ref, o_ref):
        mask = mask_ref[...]          # [NP, 1] f32, 1.0 on real node rows
        adj = adj_ref[...]            # [NP, NP] bf16 normalized adjacency
        h = x_ref[...]                # [NP, 128] f32 node features (padded)

        def vec(i):                   # (1, 128) f32 row of the stacked vectors
            return vec_ref[pl.ds(i, 1), :]

        # ----- pyg_nn.GCN: GCNConv = Â (H W) + b, ReLU between layers only.
        for l in range(n_gcn):
            w = w_ref[l]              # (128, 128) bf16
            t = jnp.dot(h.astype(jnp.bfloat16), w,
                        preferred_element_type=jnp.float32)
            h = jnp.dot(adj, t.astype(jnp.bfloat16),
                        preferred_element_type=jnp.float32) + vec(b_gcn_off + l)
            if l < n_gcn - 1:
                h = jnp.maximum(h, 0.0)

        # ----- pyg_nn.MLP hidden layers: Linear -> BatchNorm1d -> ReLU
        #       (training-mode biased batch stats over the `node_count` valid
        #        rows; affine gamma/beta applied; epilogue kept in f32)
        for l in range(n_mlp - 1):
            w = w_ref[n_gcn + l]
            h = (jnp.dot(h.astype(jnp.bfloat16), w,
                         preferred_element_type=jnp.float32)
                 + vec(b_mlp_off + l))
            hm = h * mask
            s1 = jnp.sum(hm, axis=0, keepdims=True)
            s2 = jnp.sum(hm * hm, axis=0, keepdims=True)
            mean = s1 * inv_count
            var = jnp.maximum(s2 * inv_count - mean * mean, 0.0)
            y = (h - mean) * lax.rsqrt(var + eps) * vec(gamma_off + l) \
                + vec(beta_off + l)
            # No trailing mask: padded rows are re-masked in the next layer's
            # stats and the pooling matrix has zero columns for padded nodes.
            h = jnp.maximum(y, 0.0)

        # ----- last MLP Linear (plain_last=True: no norm / activation)
        h = (jnp.dot(h.astype(jnp.bfloat16), w_ref[n_gcn + n_mlp - 1],
                     preferred_element_type=jnp.float32)
             + vec(b_mlp_off + n_mlp - 1))

        # ----- global_mean_pool as matmul with the precomputed pooling matrix
        o_ref[...] = jnp.dot(pool_ref[...], h.astype(jnp.bfloat16),
                             preferred_element_type=jnp.float32)

    return kernel


# ------------------------------ parameters -------------------------------- #
def glorot(key, shape):
    fan_in, fan_out = shape
    lim = (6.0 / (fan_in + fan_out)) ** 0.5
    return jax.random.uniform(key, shape, jnp.float32, -lim, lim)


def init_params(key, gcn_in, gcn_hidden, gcn_layers, gcn_out, mlp_channels):
    """All weights stacked into one bf16 (L,128,128) tensor and all
    bias/gamma/beta rows into one f32 (K_pad,128) tensor, padded ONCE here."""
    gcn_dims = [gcn_in] + [gcn_hidden] * (gcn_layers - 1) + [gcn_out]
    assert max(gcn_dims + list(mlp_channels)) <= LANE, "config exceeds one lane tile"
    n_gcn = gcn_layers
    n_mlp = len(mlp_channels) - 1

    w_list, gcn_b, mlp_b, bn_g, bn_b = [], [], [], [], []
    for l in range(n_gcn):
        key, k1, k2 = jax.random.split(key, 3)
        w = glorot(k1, (gcn_dims[l], gcn_dims[l + 1]))
        b = 0.1 * jax.random.normal(k2, (gcn_dims[l + 1],), jnp.float32)
        w_list.append(_pad2d(w, LANE, LANE))
        gcn_b.append(_pad2d(b, 1, LANE))
    for l in range(n_mlp):
        key, k1, k2 = jax.random.split(key, 3)
        w = glorot(k1, (mlp_channels[l], mlp_channels[l + 1]))
        b = 0.1 * jax.random.normal(k2, (mlp_channels[l + 1],), jnp.float32)
        w_list.append(_pad2d(w, LANE, LANE))
        mlp_b.append(_pad2d(b, 1, LANE))
        if l < n_mlp - 1:   # BatchNorm on hidden layers only
            bn_g.append(_pad2d(jnp.ones((mlp_channels[l + 1],), jnp.float32), 1, LANE))
            bn_b.append(_pad2d(jnp.zeros((mlp_channels[l + 1],), jnp.float32), 1, LANE))

    w_stack = jnp.stack(w_list, axis=0).astype(jnp.bfloat16)      # (L, 128, 128)
    vec = jnp.concatenate(gcn_b + mlp_b + bn_g + bn_b, axis=0)    # (K, 128) f32
    kp = _round_up(vec.shape[0], SUBLANE)
    vec = jnp.pad(vec, ((0, kp - vec.shape[0]), (0, 0)))
    return {"w": w_stack, "vec": vec}


# ------------------------------ model glue --------------------------------- #
def normalized_adjacency(edge_index, num_nodes):
    # D^{-1/2} (A + I) D^{-1/2}  (GCNConv default gcn_norm, add_self_loops=True)
    src, dst = edge_index[0], edge_index[1]
    A = jnp.zeros((num_nodes, num_nodes), jnp.float32).at[dst, src].set(1.0)
    A = A * (1.0 - jnp.eye(num_nodes)) + jnp.eye(num_nodes)
    deg = A.sum(axis=1)
    d_inv_sqrt = 1.0 / jnp.sqrt(deg)
    return d_inv_sqrt[:, None] * A * d_inv_sqrt[None, :]


def mol_gcn_forward(params, x, edge_index, batch, num_graphs, out_channels, n_gcn):
    n, _ = x.shape
    # Node axis padded to a full lane tile so the Â contraction and every
    # store are lane-dense / unmasked (a few KB of zero padding, negligible).
    np_ = _round_up(n, LANE)
    gp = _round_up(num_graphs, SUBLANE)

    adj = normalized_adjacency(edge_index, n)

    x_p = _pad2d(x, np_, LANE)
    adj_p = _pad2d(adj, np_, np_).astype(jnp.bfloat16)     # MXU operand in bf16
    mask = jnp.zeros((np_, 1), jnp.float32).at[:n, 0].set(1.0)

    # global_mean_pool as a matmul: P[g, i] = 1/|graph g| if batch[i] == g
    onehot = (batch[None, :] == jnp.arange(num_graphs)[:, None]).astype(jnp.float32)
    counts = jnp.maximum(onehot.sum(axis=1, keepdims=True), 1.0)
    pool_p = _pad2d(onehot / counts, gp, np_).astype(jnp.bfloat16)

    n_mlp = params["w"].shape[0] - n_gcn
    kernel = _make_fused_kernel(n_gcn, n_mlp, node_count=n, eps=BN_EPS)

    inputs = [x_p, adj_p, pool_p, mask, params["w"], params["vec"]]

    # VMEM limit sized from the actual resident footprint (with headroom).
    footprint = sum(a.size * a.dtype.itemsize for a in inputs) + gp * LANE * 4
    vmem_limit = int(min(max(4 * footprint, 8 << 20), 100 << 20))

    vmem = pl.BlockSpec(memory_space=pltpu.MemorySpace.VMEM)
    y_p = pl.pallas_call(
        kernel,
        out_shape=jax.ShapeDtypeStruct((gp, LANE), jnp.float32),
        in_specs=[vmem] * len(inputs),
        out_specs=vmem,
        compiler_params=pltpu.CompilerParams(vmem_limit_bytes=vmem_limit),
    )(*inputs)
    return y_p[:num_graphs, :out_channels]


if __name__ == "__main__":
    # Small, module-consistent config.
    GCN_IN, GCN_HIDDEN, GCN_LAYERS, GCN_OUT = 8, 32, 2, 16
    MLP_CHANNELS = [16, 32, 8]
    N_NODES, N_GRAPHS, N_PAIRS = 32, 2, 40

    key = jax.random.PRNGKey(0)
    key, kx, ks, kd = jax.random.split(key, 4)

    x = jax.random.normal(kx, (N_NODES, GCN_IN), jnp.float32)

    # Deterministic random undirected edges (no self-loops), symmetrized.
    src = jax.random.randint(ks, (N_PAIRS,), 0, N_NODES)
    off = jax.random.randint(kd, (N_PAIRS,), 1, N_NODES)
    dst = (src + off) % N_NODES
    edge_index = jnp.stack([jnp.concatenate([src, dst]),
                            jnp.concatenate([dst, src])], axis=0)  # [2, 80]

    # Two graphs: nodes 0..15 -> graph 0, 16..31 -> graph 1.
    batch = jnp.concatenate([jnp.zeros(16, jnp.int32), jnp.ones(16, jnp.int32)])

    params = init_params(jax.random.PRNGKey(42), GCN_IN, GCN_HIDDEN,
                         GCN_LAYERS, GCN_OUT, MLP_CHANNELS)

    fwd = jax.jit(mol_gcn_forward, static_argnums=(4, 5, 6))
    y = fwd(params, x, edge_index, batch, N_GRAPHS, MLP_CHANNELS[-1], GCN_LAYERS)
    y = jax.block_until_ready(y)
    assert y.shape == (N_GRAPHS, MLP_CHANNELS[-1])
    assert bool(jnp.all(jnp.isfinite(y)))
    print("KERNEL_OK")
</pallas_src>

<mosaic_0001>
module attributes {stable_mosaic.version = 11 : i64} {
  func.func @kernel(%arg0: memref<128x128xf32, #tpu.memory_space<vmem>>, %arg1: memref<128x128xbf16, #tpu.memory_space<vmem>>, %arg2: memref<8x128xbf16, #tpu.memory_space<vmem>>, %arg3: memref<128x1xf32, #tpu.memory_space<vmem>>, %arg4: memref<4x128x128xbf16, #tpu.memory_space<vmem>>, %arg5: memref<8x128xf32, #tpu.memory_space<vmem>>, %arg6: memref<8x128xf32, #tpu.memory_space<vmem>>) attributes {dimension_semantics = [], scalar_prefetch = 0 : i64, scratch_operands = 0 : i64, tpu.core_type = #tpu.core_type<tc>} {
    %c0 = arith.constant 0 : index
    %c0_0 = arith.constant 0 : index
    %0 = vector.load %arg3[%c0, %c0_0] : memref<128x1xf32, #tpu.memory_space<vmem>>, vector<128x1xf32>
    %c0_1 = arith.constant 0 : index
    %c0_2 = arith.constant 0 : index
    %1 = vector.load %arg1[%c0_1, %c0_2] : memref<128x128xbf16, #tpu.memory_space<vmem>>, vector<128x128xbf16>
    %c0_3 = arith.constant 0 : index
    %c0_4 = arith.constant 0 : index
    %2 = vector.load %arg0[%c0_3, %c0_4] : memref<128x128xf32, #tpu.memory_space<vmem>>, vector<128x128xf32>
    %c0_5 = arith.constant 0 : index
    %c0_6 = arith.constant 0 : index
    %c0_7 = arith.constant 0 : index
    %3 = vector.load %arg4[%c0_5, %c0_6, %c0_7] : memref<4x128x128xbf16, #tpu.memory_space<vmem>>, vector<1x128x128xbf16>
    %4 = vector.shape_cast %3 : vector<1x128x128xbf16> to vector<128x128xbf16>
    %5 = arith.truncf %2 : vector<128x128xf32> to vector<128x128xbf16>
    %cst = arith.constant dense<0.000000e+00> : vector<128x128xf32>
    %6 = tpu.matmul %5, %4, %cst {dimension_numbers = #tpu.dot_dimension_numbers<[1], [0], [0], [1], [0, 0, 1, 1], [], []>} : vector<128x128xbf16>, vector<128x128xbf16>, vector<128x128xf32> -> vector<128x128xf32>
    %7 = arith.truncf %6 : vector<128x128xf32> to vector<128x128xbf16>
    %cst_8 = arith.constant dense<0.000000e+00> : vector<128x128xf32>
    %8 = tpu.matmul %1, %7, %cst_8 {dimension_numbers = #tpu.dot_dimension_numbers<[1], [0], [0], [1], [0, 0, 1, 1], [], []>} : vector<128x128xbf16>, vector<128x128xbf16>, vector<128x128xf32> -> vector<128x128xf32>
    %c0_9 = arith.constant 0 : index
    %c0_10 = arith.constant 0 : index
    %9 = vector.load %arg5[%c0_9, %c0_10] : memref<8x128xf32, #tpu.memory_space<vmem>>, vector<1x128xf32>
    %10 = vector.broadcast %9 : vector<1x128xf32> to vector<128x128xf32>
    %11 = arith.addf %8, %10 : vector<128x128xf32>
    %cst_11 = arith.constant 0.000000e+00 : f32
    %12 = vector.broadcast %cst_11 : f32 to vector<128x128xf32>
    %13 = arith.maximumf %11, %12 : vector<128x128xf32>
    %c1 = arith.constant 1 : index
    %c0_12 = arith.constant 0 : index
    %c0_13 = arith.constant 0 : index
    %14 = vector.load %arg4[%c1, %c0_12, %c0_13] : memref<4x128x128xbf16, #tpu.memory_space<vmem>>, vector<1x128x128xbf16>
    %15 = vector.shape_cast %14 : vector<1x128x128xbf16> to vector<128x128xbf16>
    %16 = arith.truncf %13 : vector<128x128xf32> to vector<128x128xbf16>
    %cst_14 = arith.constant dense<0.000000e+00> : vector<128x128xf32>
    %17 = tpu.matmul %16, %15, %cst_14 {dimension_numbers = #tpu.dot_dimension_numbers<[1], [0], [0], [1], [0, 0, 1, 1], [], []>} : vector<128x128xbf16>, vector<128x128xbf16>, vector<128x128xf32> -> vector<128x128xf32>
    %18 = arith.truncf %17 : vector<128x128xf32> to vector<128x128xbf16>
    %cst_15 = arith.constant dense<0.000000e+00> : vector<128x128xf32>
    %19 = tpu.matmul %1, %18, %cst_15 {dimension_numbers = #tpu.dot_dimension_numbers<[1], [0], [0], [1], [0, 0, 1, 1], [], []>} : vector<128x128xbf16>, vector<128x128xbf16>, vector<128x128xf32> -> vector<128x128xf32>
    %c1_16 = arith.constant 1 : index
    %c0_17 = arith.constant 0 : index
    %20 = vector.load %arg5[%c1_16, %c0_17] : memref<8x128xf32, #tpu.memory_space<vmem>>, vector<1x128xf32>
    %21 = vector.broadcast %20 : vector<1x128xf32> to vector<128x128xf32>
    %22 = arith.addf %19, %21 : vector<128x128xf32>
    %c2 = arith.constant 2 : index
    %c0_18 = arith.constant 0 : index
    %c0_19 = arith.constant 0 : index
    %23 = vector.load %arg4[%c2, %c0_18, %c0_19] : memref<4x128x128xbf16, #tpu.memory_space<vmem>>, vector<1x128x128xbf16>
    %24 = vector.shape_cast %23 : vector<1x128x128xbf16> to vector<128x128xbf16>
    %25 = arith.truncf %22 : vector<128x128xf32> to vector<128x128xbf16>
    %cst_20 = arith.constant dense<0.000000e+00> : vector<128x128xf32>
    %26 = tpu.matmul %25, %24, %cst_20 {dimension_numbers = #tpu.dot_dimension_numbers<[1], [0], [0], [1], [0, 0, 1, 1], [], []>} : vector<128x128xbf16>, vector<128x128xbf16>, vector<128x128xf32> -> vector<128x128xf32>
    %c2_21 = arith.constant 2 : index
    %c0_22 = arith.constant 0 : index
    %27 = vector.load %arg5[%c2_21, %c0_22] : memref<8x128xf32, #tpu.memory_space<vmem>>, vector<1x128xf32>
    %28 = vector.broadcast %27 : vector<1x128xf32> to vector<128x128xf32>
    %29 = arith.addf %26, %28 : vector<128x128xf32>
    %30 = vector.broadcast %0 : vector<128x1xf32> to vector<128x128xf32>
    %31 = arith.mulf %29, %30 : vector<128x128xf32>
    %cst_23 = arith.constant dense<0.000000e+00> : vector<128xf32>
    %32 = vector.multi_reduction <add>, %31, %cst_23 [0] : vector<128x128xf32> to vector<128xf32>
    %33 = vector.shape_cast %32 : vector<128xf32> to vector<1x128xf32>
    %34 = arith.mulf %31, %31 : vector<128x128xf32>
    %cst_24 = arith.constant dense<0.000000e+00> : vector<128xf32>
    %35 = vector.multi_reduction <add>, %34, %cst_24 [0] : vector<128x128xf32> to vector<128xf32>
    %36 = vector.shape_cast %35 : vector<128xf32> to vector<1x128xf32>
    %cst_25 = arith.constant 3.125000e-02 : f32
    %37 = vector.broadcast %cst_25 : f32 to vector<1x128xf32>
    %38 = arith.mulf %33, %37 : vector<1x128xf32>
    %cst_26 = arith.constant 3.125000e-02 : f32
    %39 = vector.broadcast %cst_26 : f32 to vector<1x128xf32>
    %40 = arith.mulf %36, %39 : vector<1x128xf32>
    %41 = arith.mulf %38, %38 : vector<1x128xf32>
    %42 = arith.subf %40, %41 : vector<1x128xf32>
    %cst_27 = arith.constant 0.000000e+00 : f32
    %43 = vector.broadcast %cst_27 : f32 to vector<1x128xf32>
    %44 = arith.maximumf %42, %43 : vector<1x128xf32>
    %45 = vector.broadcast %38 : vector<1x128xf32> to vector<128x128xf32>
    %46 = arith.subf %29, %45 : vector<128x128xf32>
    %cst_28 = arith.constant 9.99999974E-6 : f32
    %47 = vector.broadcast %cst_28 : f32 to vector<1x128xf32>
    %48 = arith.addf %44, %47 : vector<1x128xf32>
    %49 = math.rsqrt %48 : vector<1x128xf32>
    %50 = vector.broadcast %49 : vector<1x128xf32> to vector<128x128xf32>
    %51 = arith.mulf %46, %50 : vector<128x128xf32>
    %c4 = arith.constant 4 : index
    %c0_29 = arith.constant 0 : index
    %52 = vector.load %arg5[%c4, %c0_29] : memref<8x128xf32, #tpu.memory_space<vmem>>, vector<1x128xf32>
    %53 = vector.broadcast %52 : vector<1x128xf32> to vector<128x128xf32>
    %54 = arith.mulf %51, %53 : vector<128x128xf32>
    %c5 = arith.constant 5 : index
    %c0_30 = arith.constant 0 : index
    %55 = vector.load %arg5[%c5, %c0_30] : memref<8x128xf32, #tpu.memory_space<vmem>>, vector<1x128xf32>
    %56 = vector.broadcast %55 : vector<1x128xf32> to vector<128x128xf32>
    %57 = arith.addf %54, %56 : vector<128x128xf32>
    %cst_31 = arith.constant 0.000000e+00 : f32
    %58 = vector.broadcast %cst_31 : f32 to vector<128x128xf32>
    %59 = arith.maximumf %57, %58 : vector<128x128xf32>
    %60 = arith.truncf %59 : vector<128x128xf32> to vector<128x128xbf16>
    %c3 = arith.constant 3 : index
    %c0_32 = arith.constant 0 : index
    %c0_33 = arith.constant 0 : index
    %61 = vector.load %arg4[%c3, %c0_32, %c0_33] : memref<4x128x128xbf16, #tpu.memory_space<vmem>>, vector<1x128x128xbf16>
    %62 = vector.shape_cast %61 : vector<1x128x128xbf16> to vector<128x128xbf16>
    %cst_34 = arith.constant dense<0.000000e+00> : vector<128x128xf32>
    %63 = tpu.matmul %60, %62, %cst_34 {dimension_numbers = #tpu.dot_dimension_numbers<[1], [0], [0], [1], [0, 0, 1, 1], [], []>} : vector<128x128xbf16>, vector<128x128xbf16>, vector<128x128xf32> -> vector<128x128xf32>
    %c3_35 = arith.constant 3 : index
    %c0_36 = arith.constant 0 : index
    %64 = vector.load %arg5[%c3_35, %c0_36] : memref<8x128xf32, #tpu.memory_space<vmem>>, vector<1x128xf32>
    %65 = vector.broadcast %64 : vector<1x128xf32> to vector<128x128xf32>
    %66 = arith.addf %63, %65 : vector<128x128xf32>
    %c0_37 = arith.constant 0 : index
    %c0_38 = arith.constant 0 : index
    %67 = vector.load %arg2[%c0_37, %c0_38] : memref<8x128xbf16, #tpu.memory_space<vmem>>, vector<8x128xbf16>
    %68 = arith.truncf %66 : vector<128x128xf32> to vector<128x128xbf16>
    %cst_39 = arith.constant dense<0.000000e+00> : vector<8x128xf32>
    %69 = tpu.matmul %67, %68, %cst_39 {dimension_numbers = #tpu.dot_dimension_numbers<[1], [0], [0], [1], [0, 0, 1, 1], [], []>} : vector<8x128xbf16>, vector<128x128xbf16>, vector<8x128xf32> -> vector<8x128xf32>
    %c0_40 = arith.constant 0 : index
    %c0_41 = arith.constant 0 : index
    %70 = vector.load %arg6[%c0_40, %c0_41] : memref<8x128xf32, #tpu.memory_space<vmem>>, vector<8x128xf32>
    tpu.vector_store %arg6[%c0_40, %c0_41], %69 {strides = array<i32>} : memref<8x128xf32, #tpu.memory_space<vmem>>, vector<8x128xf32>,
    return
  }
}

</mosaic_0001>

<bundles_post_ra>
// kernel: mol_gcn_forward.1
= control target key start
LH: loop header
LB: loop body
LE: loop exit
PB: predicated region body
PF: predicated region fallthrough
CT: control target
= control target key end

     0   :  { %s1779_s4 = inlined_call_operand.vmem [shape: bf16[4,128,128], index: 4, kind: input, shape index: {}]   ;;  %s1780_s0 = inlined_call_operand.vmem [shape: f32[128,128], index: 0, kind: input, shape index: {}]   ;;  %s1781_s5 = inlined_call_operand.vmem [shape: f32[8,128], index: 5, kind: input, shape index: {}]   ;;  %s1782_s1 = inlined_call_operand.vmem [shape: bf16[128,128], index: 1, kind: input, shape index: {}]   ;;  %s1783_s3 = inlined_call_operand.vmem [shape: f32[128,1], index: 3, kind: input, shape index: {}]   ;;  %s1784_s2 = inlined_call_operand.vmem [shape: bf16[8,128], index: 2, kind: input, shape index: {}]   ;;  %s1785_s6 = inlined_call_operand.vmem [shape: f32[8,128], index: 6, kind: output, shape index: {}]  }
   0x1   :  { %v1248_v0 = vld [vmem:[%s1779_s4 + $0x38] sm:$0xff]  ;;  %v1247_v1 = vld [vmem:[%s1779_s4 + $0x30] sm:$0xff]  ;;  %v1246_v2 = vld [vmem:[%s1779_s4 + $0x28] sm:$0xff] }
   0x2   :  { %143 = vmatpush.bf16.msra.mxu0 %v1248_v0  ;;  %1273 = vmatpush.bf16.msra.mxu3 %v1248_v0  ;;  %v1245_v3 = vld [vmem:[%s1779_s4 + $0x20] sm:$0xff]  ;;  %v1244_v4 = vld [vmem:[%s1779_s4 + $0x18] sm:$0xff]  ;;  %v1243_v5 = vld [vmem:[%s1779_s4 + $0x10] sm:$0xff] }
   0x3   :  { %v1242_v6 = vld [vmem:[%s1779_s4 + $0x8] sm:$0xff]  ;;  %v1241_v7 = vld [vmem:[%s1779_s4] sm:$0xff]  ;;  %v65_v10 = vld [vmem:[%s1780_s0 + $0x50] sm:$0xff] }
   0x4   :  { %v55_v8 = vld [vmem:[%s1780_s0] sm:$0xff]  ;;  %v56_v9 = vld [vmem:[%s1780_s0 + $0x8] sm:$0xff]  ;;  %v66_v11 = vld [vmem:[%s1780_s0 + $0x58] sm:$0xff] }
   0x5   :  { %v87_v12 = vpack.c.bf16 %v56_v9, %v55_v8  ;;  %v92_v13 = vpack.c.bf16 %v66_v11, %v65_v10  ;;  %v57_v14 = vld [vmem:[%s1780_s0 + $0x10] sm:$0xff]  ;;  %v58_v15 = vld [vmem:[%s1780_s0 + $0x18] sm:$0xff]  ;;  %v67_v16 = vld [vmem:[%s1780_s0 + $0x60] sm:$0xff] }
   0x6   :  { %144 = vmatpush.bf16.msra.mxu0 %v1247_v1  ;;  %1274 = vmatpush.bf16.msra.mxu3 %v1247_v1  ;;  %v68_v17 = vld [vmem:[%s1780_s0 + $0x68] sm:$0xff]  ;;  %v88_v18 = vpack.c.bf16 %v58_v15, %v57_v14  ;;  %v59_v20 = vld [vmem:[%s1780_s0 + $0x20] sm:$0xff]  ;;  %v69_v22 = vld [vmem:[%s1780_s0 + $0x70] sm:$0xff] }
   0x7   :  { %v93_v19 = vpack.c.bf16 %v68_v17, %v67_v16  ;;  %v60_v21 = vld [vmem:[%s1780_s0 + $0x28] sm:$0xff]  ;;  %v70_v23 = vld [vmem:[%s1780_s0 + $0x78] sm:$0xff]  ;;  %v61_v26 = vld [vmem:[%s1780_s0 + $0x30] sm:$0xff] }
   0x8   :  { %v89_v24 = vpack.c.bf16 %v60_v21, %v59_v20  ;;  %v94_v25 = vpack.c.bf16 %v70_v23, %v69_v22  ;;  %v62_v27 = vld [vmem:[%s1780_s0 + $0x38] sm:$0xff]  ;;  %v63_v29 = vld [vmem:[%s1780_s0 + $0x40] sm:$0xff]  ;;  %v64_v30 = vld [vmem:[%s1780_s0 + $0x48] sm:$0xff] }
   0x9   :  { %v90_v28 = vpack.c.bf16 %v62_v27, %v61_v26  ;;  %v91_v31 = vpack.c.bf16 %v64_v30, %v63_v29  ;;  %v1412_v56 = vld [vmem:[%s1782_s1] sm:$0xff]  ;;  %v1418_v57 = vld [vmem:[%s1782_s1 + $0x8] sm:$0xff]  ;;  %v1424_v58 = vld [vmem:[%s1782_s1 + $0x10] sm:$0xff] }
   0xa   :  { %145 = vmatpush.bf16.msra.mxu0 %v1246_v2  ;;  %1275 = vmatpush.bf16.msra.mxu3 %v1246_v2  ;;  %v1430_v59 = vld [vmem:[%s1782_s1 + $0x28] sm:$0xff]  ;;  %v1256_v60 = vld [vmem:[%s1779_s4 + $0x78] sm:$0xff]  ;;  %v1255_v61 = vld [vmem:[%s1779_s4 + $0x70] sm:$0xff] }
   0xb   :  { %v1254_v62 = vld [vmem:[%s1779_s4 + $0x68] sm:$0xff]  ;;  %v1445_v63 = vld [vmem:[%s1782_s1 + $0x18] sm:$0xff]  ;;  %v1253_v0 = vld [vmem:[%s1779_s4 + $0x60] sm:$0xff] }
   0xc   :  { %v1453_v1 = vld [vmem:[%s1782_s1 + $0x30] sm:$0xff]  ;;  %v1460_v2 = vld [vmem:[%s1782_s1 + $0x20] sm:$0xff] }
   0xd   :  { %v1293_v9 = vld [vmem:[%s1781_s5] ss:$0 sm:$0xff] }
   0xe   :  { %146 = vmatpush.bf16.msra.mxu0 %v1245_v3  ;;  %1276 = vmatpush.bf16.msra.mxu3 %v1245_v3  ;;  %v1465_v3 = vld [vmem:[%s1782_s1 + $0x38] sm:$0xff] }
  0x12   :  { %147 = vmatpush.bf16.msra.mxu0 %v1244_v4  ;;  %1277 = vmatpush.bf16.msra.mxu3 %v1244_v4  ;;  %v1252_v4 = vld [vmem:[%s1779_s4 + $0x58] sm:$0xff] }
  0x16   :  { %148 = vmatpush.bf16.msra.mxu0 %v1243_v5  ;;  %1278 = vmatpush.bf16.msra.mxu3 %v1243_v5  ;;  %v1251_v5 = vld [vmem:[%s1779_s4 + $0x50] sm:$0xff] }
  0x1a   :  { %149 = vmatpush.bf16.msra.mxu0 %v1242_v6  ;;  %1279 = vmatpush.bf16.msra.mxu3 %v1242_v6  ;;  %v1250_v6 = vld [vmem:[%s1779_s4 + $0x48] sm:$0xff] }
  0x1e   :  { %150 = vmatpush.bf16.msra.mxu0 %v1241_v7  ;;  %1280 = vmatpush.bf16.msra.mxu3 %v1241_v7  ;;  %v1249_v7 = vld [vmem:[%s1779_s4 + $0x40] sm:$0xff] }
  0x21   :  { %151 = vmatmul.bf16.vlgmr.msra.gmra.mxu0 %v87_v12  ;;  %176 = vmatmul.bf16.vlgmr.msra.gmra.mxu3 %v92_v13 }
  0x31   :  { %156 = vmatmul.bf16.gmra.mxu0 %v88_v18  ;;  %181 = vmatmul.bf16.gmra.mxu3 %v93_v19 }
  0x41   :  { %161 = vmatmul.bf16.gmra.mxu0 %v89_v24  ;;  %186 = vmatmul.bf16.gmra.mxu3 %v94_v25 }
  0x51   :  { %166 = vmatmul.bf16.gmra.mxu0 %v90_v28 }
  0x61   :  { %171 = vmatmul.bf16.gmra.mxu0 %v91_v31 }
  0x9e   :  { %v152_v32 = vpop.f32.mrf.mxu0 }
  0xa4   :  { %v177_v33 = vpop.f32.mrf.mxu3 }
  0xa6   :  { %v154_v34 = vpop.f32.mrf.mxu0 }
  0xa7   :  { %v192_v55 = vpack.c.bf16 %v154_v34, %v152_v32 }
  0xac   :  { %v179_v35 = vpop.f32.mrf.mxu3 }
  0xad   :  { %v197_v47 = vpack.c.bf16 %v179_v35, %v177_v33 }
  0xae   :  { %v157_v36 = vpop.f32.mrf.mxu0 }
  0xb4   :  { %v182_v37 = vpop.f32.mrf.mxu3 }
  0xb6   :  { %v159_v38 = vpop.f32.mrf.mxu0 }
  0xb7   :  { %v193_v54 = vpack.c.bf16 %v159_v38, %v157_v36 }
  0xbc   :  { %v184_v39 = vpop.f32.mrf.mxu3 }
  0xbd   :  { %v198_v46 = vpack.c.bf16 %v184_v39, %v182_v37 }
  0xbe   :  { %v162_v40 = vpop.f32.mrf.mxu0 }
  0xc4   :  { %v187_v41 = vpop.f32.mrf.mxu3 }
  0xc6   :  { %v164_v42 = vpop.f32.mrf.mxu0 }
  0xc7   :  { %v194_v53 = vpack.c.bf16 %v164_v42, %v162_v40 }
  0xcc   :  { %v189_v43 = vpop.f32.mrf.mxu3 }
  0xcd   :  { %v199_v44 = vpack.c.bf16 %v189_v43, %v187_v41 }
  0xce   :  { %v167_v45 = vpop.f32.mrf.mxu0 }
  0xcf   :  { %250 = vmatpush.bf16.msra.mxu1 %v199_v44  ;;  %1281 = vmatpush.bf16.msra.mxu2 %v199_v44 }
  0xd3   :  { %251 = vmatpush.bf16.msra.mxu1 %v198_v46  ;;  %1282 = vmatpush.bf16.msra.mxu2 %v198_v46 }
  0xd6   :  { %v169_v48 = vpop.f32.mrf.mxu0 }
  0xd7   :  { %252 = vmatpush.bf16.msra.mxu1 %v197_v47  ;;  %1283 = vmatpush.bf16.msra.mxu2 %v197_v47  ;;  %v195_v52 = vpack.c.bf16 %v169_v48, %v167_v45 }
  0xde   :  { %v172_v49 = vpop.f32.mrf.mxu0 }
  0xe6   :  { %v174_v50 = vpop.f32.mrf.mxu0 }
  0xe7   :  { %v196_v51 = vpack.c.bf16 %v174_v50, %v172_v49 }
  0xe9   :  { %253 = vmatpush.bf16.msra.mxu1 %v196_v51  ;;  %1284 = vmatpush.bf16.msra.mxu2 %v196_v51 }
  0xed   :  { %254 = vmatpush.bf16.msra.mxu1 %v195_v52  ;;  %1285 = vmatpush.bf16.msra.mxu2 %v195_v52 }
  0xf1   :  { %255 = vmatpush.bf16.msra.mxu1 %v194_v53  ;;  %1286 = vmatpush.bf16.msra.mxu2 %v194_v53 }
  0xf5   :  { %256 = vmatpush.bf16.msra.mxu1 %v193_v54  ;;  %1287 = vmatpush.bf16.msra.mxu2 %v193_v54 }
  0xf9   :  { %257 = vmatpush.bf16.msra.mxu1 %v192_v55  ;;  %1288 = vmatpush.bf16.msra.mxu2 %v192_v55 }
  0xfc   :  { %258 = vmatmul.bf16.vlgmr.msra.gmra.mxu1 %v1412_v56  ;;  %283 = vmatmul.bf16.vlgmr.msra.gmra.mxu2 %v1430_v59 }
  0xfd   :  { %388 = vmatpush.bf16.msrb.mxu2 %v1256_v60 }
 0x101   :  { %389 = vmatpush.bf16.msrb.mxu2 %v1255_v61 }
 0x105   :  { %390 = vmatpush.bf16.msrb.mxu2 %v1254_v62 }
 0x109   :  { %391 = vmatpush.bf16.msrb.mxu2 %v1253_v0 }
 0x10c   :  { %263 = vmatmul.bf16.gmra.mxu1 %v1418_v57  ;;  %288 = vmatmul.bf16.gmra.mxu2 %v1453_v1 }
 0x10d   :  { %392 = vmatpush.bf16.msrb.mxu2 %v1252_v4 }
 0x111   :  { %393 = vmatpush.bf16.msrb.mxu2 %v1251_v5 }
 0x115   :  { %394 = vmatpush.bf16.msrb.mxu2 %v1250_v6 }
 0x119   :  { %395 = vmatpush.bf16.msrb.mxu2 %v1249_v7 }
 0x11c   :  { %268 = vmatmul.bf16.gmra.mxu1 %v1424_v58  ;;  %293 = vmatmul.bf16.gmra.mxu2 %v1465_v3 }
 0x12c   :  { %273 = vmatmul.bf16.gmra.mxu1 %v1445_v63 }
 0x13c   :  { %278 = vmatmul.bf16.gmra.mxu1 %v1460_v2 }
 0x179   :  { %v259_v8 = vpop.f32.mrf.mxu1 }
 0x17a   :  { %v260_v10 = vadd.f32 %v1293_v9, %v259_v8 }
 0x17c   :  { %v299_v13 = vmax.f32 %v260_v10, 0.0 }
 0x17f   :  { %v284_v38 = vpop.f32.mrf.mxu2 }
 0x180   :  { %v285_v47 = vadd.f32 %v1293_v9, %v284_v38  ;;  %v1525_v38 = vld [vmem:[%s1781_s5 + $0x1] ss:$0 sm:$0xff] }
 0x181   :  { %v261_v11 = vpop.f32.mrf.mxu1 }
 0x182   :  { %v262_v12 = vadd.f32 %v1293_v9, %v261_v11  ;;  %v309_v49 = vmax.f32 %v285_v47, 0.0 }
 0x184   :  { %v300_v14 = vmax.f32 %v262_v12, 0.0 }
 0x186   :  { %v332_v15 = vpack.c.bf16 %v300_v14, %v299_v13 }
 0x187   :  { %v286_v42 = vpop.f32.mrf.mxu2 }
 0x188   :  { %396 = vmatmul.bf16.vlgmr.msrb.gmra.mxu2 %v332_v15  ;;  %v287_v48 = vadd.f32 %v1293_v9, %v286_v42 }
 0x189   :  { %v264_v16 = vpop.f32.mrf.mxu1 }
 0x18a   :  { %v265_v17 = vadd.f32 %v1293_v9, %v264_v16  ;;  %v310_v50 = vmax.f32 %v287_v48, 0.0 }
 0x18c   :  { %v301_v20 = vmax.f32 %v265_v17, 0.0  ;;  %v337_v51 = vpack.c.bf16 %v310_v50, %v309_v49 }
 0x18f   :  { %v289_v46 = vpop.f32.mrf.mxu2 }
 0x190   :  { %v290_v53 = vadd.f32 %v1293_v9, %v289_v46 }
 0x191   :  { %v266_v18 = vpop.f32.mrf.mxu1 }
 0x192   :  { %v267_v19 = vadd.f32 %v1293_v9, %v266_v18  ;;  %v311_v60 = vmax.f32 %v290_v53, 0.0  ;;  %v29_v53 = vld [vmem:[%s1783_s3 + $0x30] sm:$0xff] }
 0x194   :  { %v302_v21 = vmax.f32 %v267_v19, 0.0 }
 0x196   :  { %v333_v22 = vpack.c.bf16 %v302_v21, %v301_v20 }
 0x197   :  { %v291_v52 = vpop.f32.mrf.mxu2 }
 0x198   :  { %401 = vmatmul.bf16.gmra.mxu2 %v333_v22  ;;  %v292_v54 = vadd.f32 %v1293_v9, %v291_v52 }
 0x199   :  { %v269_v23 = vpop.f32.mrf.mxu1 }
 0x19a   :  { %v270_v24 = vadd.f32 %v1293_v9, %v269_v23  ;;  %v312_v61 = vmax.f32 %v292_v54, 0.0 }
 0x19c   :  { %v303_v27 = vmax.f32 %v270_v24, 0.0  ;;  %v338_v62 = vpack.c.bf16 %v312_v61, %v311_v60  ;;  %v27_v60 = vld [vmem:[%s1783_s3 + $0x20] sm:$0xff]  ;;  %v30_v61 = vld [vmem:[%s1783_s3 + $0x38] sm:$0xff] }
 0x19f   :  { %v294_v55 = vpop.f32.mrf.mxu2 }
 0x1a0   :  { %v295_v4 = vadd.f32 %v1293_v9, %v294_v55 }
 0x1a1   :  { %v271_v25 = vpop.f32.mrf.mxu1 }
 0x1a2   :  { %v272_v26 = vadd.f32 %v1293_v9, %v271_v25  ;;  %v313_v6 = vmax.f32 %v295_v4, 0.0 }
 0x1a4   :  { %v304_v28 = vmax.f32 %v272_v26, 0.0 }
 0x1a6   :  { %v334_v29 = vpack.c.bf16 %v304_v28, %v303_v27 }
 0x1a7   :  { %v296_v0 = vpop.f32.mrf.mxu2 }
 0x1a8   :  { %406 = vmatmul.bf16.gmra.mxu2 %v334_v29  ;;  %v297_v5 = vadd.f32 %v1293_v9, %v296_v0 }
 0x1a9   :  { %v274_v30 = vpop.f32.mrf.mxu1 }
 0x1aa   :  { %v275_v31 = vadd.f32 %v1293_v9, %v274_v30  ;;  %v314_v7 = vmax.f32 %v297_v5, 0.0  ;;  %v28_v5 = vld [vmem:[%s1783_s3 + $0x28] sm:$0xff] }
 0x1ac   :  { %v305_v34 = vmax.f32 %v275_v31, 0.0  ;;  %v339_v8 = vpack.c.bf16 %v314_v7, %v313_v6  ;;  %v32_v6 = vld [vmem:[%s1783_s3 + $0x48] sm:$0xff] }
 0x1b1   :  { %v276_v32 = vpop.f32.mrf.mxu1 }
 0x1b2   :  { %v277_v33 = vadd.f32 %v1293_v9, %v276_v32 }
 0x1b4   :  { %v306_v35 = vmax.f32 %v277_v33, 0.0  ;;  %v1264_v33 = vld [vmem:[%s1779_s4 + $0xb8] sm:$0xff] }
 0x1b5   :  { %571 = vmatpush.bf16.msrb.mxu0 %v1264_v33 }
 0x1b6   :  { %v335_v36 = vpack.c.bf16 %v306_v35, %v305_v34  ;;  %v1263_v34 = vld [vmem:[%s1779_s4 + $0xb0] sm:$0xff]  ;;  %v1301_v35 = vmov 0  }
 0x1b7   :  { %1290 = vset.pattern.permute.xlu0 %v1301_v35  ;;  %1291 = vset.pattern.permute.xlu1 %v1301_v35 }
 0x1b8   :  { %411 = vmatmul.bf16.gmra.mxu2 %v335_v36  ;;  %1292 = vset.pattern.permute.xlu2 %v1301_v35 }
 0x1b9   :  { %v279_v37 = vpop.f32.mrf.mxu1  ;;  %572 = vmatpush.bf16.msrb.mxu0 %v1263_v34  ;;  %642 = vperm.xlu2 %1292, %v27_v60  }
 0x1ba   :  { %v280_v39 = vadd.f32 %v1293_v9, %v279_v37  ;;  %v24_v37 = vld [vmem:[%s1783_s3 + $0x8] sm:$0xff] }
 0x1bc   :  { %v307_v43 = vmax.f32 %v280_v39, 0.0 }
 0x1c1   :  { %v281_v40 = vpop.f32.mrf.mxu1  ;;  %647 = vperm.xlu2 %1292, %v28_v5  }
 0x1c2   :  { %v282_v41 = vadd.f32 %v1293_v9, %v281_v40 }
 0x1c4   :  { %v308_v44 = vmax.f32 %v282_v41, 0.0  ;;  %v25_v41 = vld [vmem:[%s1783_s3 + $0x10] sm:$0xff] }
 0x1c5   :  { %632 = vperm.xlu1 %1291, %v25_v41  }
 0x1c6   :  { %v336_v45 = vpack.c.bf16 %v308_v44, %v307_v43  ;;  %v26_v44 = vld [vmem:[%s1783_s3 + $0x18] sm:$0xff] }
 0x1c8   :  { %416 = vmatmul.bf16.gmra.mxu2 %v336_v45 }
 0x1cd   :  { %637 = vperm.xlu1 %1291, %v26_v44  }
 0x1d5   :  { %657 = vperm.xlu1 %1291, %v30_v61  }
 0x1d8   :  { %421 = vmatmul.bf16.gmra.mxu2 %v337_v51 }
 0x1e8   :  { %426 = vmatmul.bf16.gmra.mxu2 %v338_v62 }
 0x1f8   :  { %431 = vmatmul.bf16.gmra.mxu2 %v339_v8 }
 0x20b   :  { %v397_v10 = vpop.f32.mrf.mxu2 }
 0x213   :  { %v399_v11 = vpop.f32.mrf.mxu2 }
 0x214   :  { %v437_v12 = vpack.c.bf16 %v399_v11, %v397_v10  ;;  %v35_v10 = vld [vmem:[%s1783_s3 + $0x60] sm:$0xff]  ;;  %v33_v11 = vld [vmem:[%s1783_s3 + $0x50] sm:$0xff] }
 0x215   :  { %672 = vperm.xlu1 %1291, %v33_v11  }
 0x21b   :  { %v402_v13 = vpop.f32.mrf.mxu2 }
 0x223   :  { %v404_v14 = vpop.f32.mrf.mxu2 }
 0x224   :  { %v438_v15 = vpack.c.bf16 %v404_v14, %v402_v13 }
 0x22b   :  { %v407_v16 = vpop.f32.mrf.mxu2 }
 0x233   :  { %v409_v17 = vpop.f32.mrf.mxu2 }
 0x234   :  { %v439_v18 = vpack.c.bf16 %v409_v17, %v407_v16  ;;  %v36_v17 = vld [vmem:[%s1783_s3 + $0x68] sm:$0xff] }
 0x235   :  { %687 = vperm.xlu1 %1291, %v36_v17  }
 0x23b   :  { %v412_v19 = vpop.f32.mrf.mxu2 }
 0x243   :  { %v414_v20 = vpop.f32.mrf.mxu2 }
 0x244   :  { %v440_v21 = vpack.c.bf16 %v414_v20, %v412_v19  ;;  %v31_v19 = vld [vmem:[%s1783_s3 + $0x40] sm:$0xff] }
 0x245   :  { %662 = vperm.xlu2 %1292, %v31_v19  }
 0x24b   :  { %v417_v22 = vpop.f32.mrf.mxu2 }
 0x253   :  { %v419_v23 = vpop.f32.mrf.mxu2 }
 0x254   :  { %v441_v32 = vpack.c.bf16 %v419_v23, %v417_v22 }
 0x25b   :  { %v422_v24 = vpop.f32.mrf.mxu2 }
 0x263   :  { %v424_v9 = vpop.f32.mrf.mxu2 }
 0x264   :  { %v442_v31 = vpack.c.bf16 %v424_v9, %v422_v24  ;;  %v34_v24 = vld [vmem:[%s1783_s3 + $0x58] sm:$0xff] }
 0x265   :  { %677 = vperm.xlu2 %1292, %v34_v24  }
 0x26b   :  { %v427_v25 = vpop.f32.mrf.mxu2 }
 0x273   :  { %v429_v26 = vpop.f32.mrf.mxu2 }
 0x274   :  { %v443_v30 = vpack.c.bf16 %v429_v26, %v427_v25  ;;  %v37_v25 = vld [vmem:[%s1783_s3 + $0x70] sm:$0xff] }
 0x275   :  { %692 = vperm.xlu2 %1292, %v37_v25  }
 0x27b   :  { %v432_v27 = vpop.f32.mrf.mxu2 }
 0x283   :  { %v434_v28 = vpop.f32.mrf.mxu2 }
 0x284   :  { %v444_v29 = vpack.c.bf16 %v434_v28, %v432_v27 }
 0x286   :  { %447 = vmatpush.bf16.msrb.mxu3 %v444_v29 }
 0x28a   :  { %448 = vmatpush.bf16.msrb.mxu3 %v443_v30 }
 0x28e   :  { %449 = vmatpush.bf16.msrb.mxu3 %v442_v31 }
 0x292   :  { %450 = vmatpush.bf16.msrb.mxu3 %v441_v32 }
 0x296   :  { %451 = vmatpush.bf16.msrb.mxu3 %v440_v21 }
 0x29a   :  { %452 = vmatpush.bf16.msrb.mxu3 %v439_v18 }
 0x29e   :  { %453 = vmatpush.bf16.msrb.mxu3 %v438_v15  ;;  %v38_v15 = vld [vmem:[%s1783_s3 + $0x78] sm:$0xff] }
 0x2a2   :  { %454 = vmatpush.bf16.msrb.mxu3 %v437_v12 }
 0x2a5   :  { %455 = vmatmul.bf16.vlgmr.msrb.gmra.mxu3 %v1412_v56  ;;  %v1262_v56 = vld [vmem:[%s1779_s4 + $0xa8] sm:$0xff] }
 0x2a6   :  { %573 = vmatpush.bf16.msrb.mxu0 %v1262_v56 }
 0x2b5   :  { %460 = vmatmul.bf16.gmra.mxu3 %v1418_v57  ;;  %v1261_v57 = vld [vmem:[%s1779_s4 + $0xa0] sm:$0xff] }
 0x2b6   :  { %574 = vmatpush.bf16.msrb.mxu0 %v1261_v57 }
 0x2c5   :  { %465 = vmatmul.bf16.gmra.mxu3 %v1424_v58  ;;  %v1260_v58 = vld [vmem:[%s1779_s4 + $0x98] sm:$0xff] }
 0x2c6   :  { %575 = vmatpush.bf16.msrb.mxu0 %v1260_v58 }
 0x2d5   :  { %470 = vmatmul.bf16.gmra.mxu3 %v1445_v63  ;;  %v1258_v63 = vld [vmem:[%s1779_s4 + $0x88] sm:$0xff] }
 0x2e5   :  { %475 = vmatmul.bf16.gmra.mxu3 %v1460_v2  ;;  %v1257_v2 = vld [vmem:[%s1779_s4 + $0x80] sm:$0xff] }
 0x2f5   :  { %480 = vmatmul.bf16.gmra.mxu3 %v1430_v59  ;;  %v1259_v59 = vld [vmem:[%s1779_s4 + $0x90] sm:$0xff] }
 0x2f6   :  { %576 = vmatpush.bf16.msrb.mxu0 %v1259_v59 }
 0x2fa   :  { %577 = vmatpush.bf16.msrb.mxu0 %v1258_v63 }
 0x2fe   :  { %578 = vmatpush.bf16.msrb.mxu0 %v1257_v2 }
 0x305   :  { %485 = vmatmul.bf16.gmra.mxu3 %v1453_v1  ;;  %v23_v1 = vld [vmem:[%s1783_s3] sm:$0xff] }
 0x306   :  { %622 = vperm.xlu0 %1290, %v23_v1  }
 0x30e   :  { %627 = vperm.xlu0 %1290, %v24_v37  }
 0x315   :  { %490 = vmatmul.bf16.gmra.mxu3 %v1465_v3 }
 0x316   :  { %652 = vperm.xlu0 %1290, %v29_v53  }
 0x31e   :  { %667 = vperm.xlu0 %1290, %v32_v6  }
 0x326   :  { %682 = vperm.xlu0 %1290, %v35_v10  }
 0x328   :  { %v456_v36 = vpop.f32.mrf.mxu3 }
 0x329   :  { %v457_v39 = vadd.f32 %v1525_v38, %v456_v36 }
 0x32e   :  { %697 = vperm.xlu0 %1290, %v38_v15  }
 0x330   :  { %v458_v3 = vpop.f32.mrf.mxu3 }
 0x331   :  { %v459_v40 = vadd.f32 %v1525_v38, %v458_v3 }
 0x333   :  { %v513_v42 = vpack.c.bf16 %v459_v40, %v457_v39  ;;  %v633_v39 = vpop.permute.xlu1 %632  ;;  %v643_v40 = vpop.permute.xlu2 %642 }
 0x335   :  { %579 = vmatmul.bf16.vlgmr.msrb.gmra.mxu0 %v513_v42 }
 0x338   :  { %v461_v43 = vpop.f32.mrf.mxu3 }
 0x339   :  { %v462_v46 = vadd.f32 %v1525_v38, %v461_v43 }
 0x340   :  { %v463_v45 = vpop.f32.mrf.mxu3 }
 0x341   :  { %v464_v47 = vadd.f32 %v1525_v38, %v463_v45 }
 0x343   :  { %v514_v48 = vpack.c.bf16 %v464_v47, %v462_v46  ;;  %v638_v46 = vpop.permute.xlu1 %637 }
 0x345   :  { %584 = vmatmul.bf16.gmra.mxu0 %v514_v48 }
 0x348   :  { %v466_v49 = vpop.f32.mrf.mxu3 }
 0x349   :  { %v467_v51 = vadd.f32 %v1525_v38, %v466_v49 }
 0x34b   :  { %v658_v6 = vpop.permute.xlu1 %657 }
 0x350   :  { %v468_v50 = vpop.f32.mrf.mxu3 }
 0x351   :  { %v469_v52 = vadd.f32 %v1525_v38, %v468_v50  ;;  %v648_v50 = vpop.permute.xlu2 %647 }
 0x353   :  { %v515_v54 = vpack.c.bf16 %v469_v52, %v467_v51 }
 0x355   :  { %589 = vmatmul.bf16.gmra.mxu0 %v515_v54 }
 0x358   :  { %v471_v55 = vpop.f32.mrf.mxu3 }
 0x359   :  { %v472_v0 = vadd.f32 %v1525_v38, %v471_v55 }
 0x360   :  { %v473_v62 = vpop.f32.mrf.mxu3 }
 0x361   :  { %v474_v4 = vadd.f32 %v1525_v38, %v473_v62 }
 0x363   :  { %v516_v7 = vpack.c.bf16 %v474_v4, %v472_v0 }
 0x365   :  { %594 = vmatmul.bf16.gmra.mxu0 %v516_v7 }
 0x368   :  { %v476_v8 = vpop.f32.mrf.mxu3 }
 0x369   :  { %v477_v13 = vadd.f32 %v1525_v38, %v476_v8 }
 0x370   :  { %v478_v12 = vpop.f32.mrf.mxu3 }
 0x371   :  { %v479_v14 = vadd.f32 %v1525_v38, %v478_v12 }
 0x373   :  { %v517_v16 = vpack.c.bf16 %v479_v14, %v477_v13  ;;  %v663_v14 = vpop.permute.xlu2 %662 }
 0x375   :  { %599 = vmatmul.bf16.gmra.mxu0 %v517_v16 }
 0x378   :  { %v481_v18 = vpop.f32.mrf.mxu3  ;;  %v623_v3 = vpop.permute.xlu0 %622 }
 0x379   :  { %v482_v21 = vadd.f32 %v1525_v38, %v481_v18 }
 0x380   :  { %v483_v20 = vpop.f32.mrf.mxu3  ;;  %v628_v43 = vpop.permute.xlu0 %627 }
 0x381   :  { %v484_v22 = vadd.f32 %v1525_v38, %v483_v20 }
 0x383   :  { %v518_v23 = vpack.c.bf16 %v484_v22, %v482_v21 }
 0x385   :  { %604 = vmatmul.bf16.gmra.mxu0 %v518_v23 }
 0x388   :  { %v486_v9 = vpop.f32.mrf.mxu3  ;;  %v653_v61 = vpop.permute.xlu0 %652 }
 0x389   :  { %v487_v27 = vadd.f32 %v1525_v38, %v486_v9 }
 0x390   :  { %v488_v26 = vpop.f32.mrf.mxu3  ;;  %v668_v24 = vpop.permute.xlu0 %667 }
 0x391   :  { %v489_v28 = vadd.f32 %v1525_v38, %v488_v26 }
 0x393   :  { %v519_v29 = vpack.c.bf16 %v489_v28, %v487_v27 }
 0x395   :  { %609 = vmatmul.bf16.gmra.mxu0 %v519_v29  ;;  %v673_v29 = vpop.permute.xlu1 %672 }
 0x398   :  { %v491_v30 = vpop.f32.mrf.mxu3 }
 0x399   :  { %v492_v32 = vadd.f32 %v1525_v38, %v491_v30 }
 0x3a0   :  { %v493_v31 = vpop.f32.mrf.mxu3 }
 0x3a1   :  { %v494_v33 = vadd.f32 %v1525_v38, %v493_v31  ;;  %v1588_v38 = vld [vmem:[%s1781_s5 + $0x2] ss:$0 sm:$0xff] }
 0x3a3   :  { %v520_v34 = vpack.c.bf16 %v494_v33, %v492_v32 }
 0x3a5   :  { %614 = vmatmul.bf16.gmra.mxu0 %v520_v34 }
 0x3b2   :  { %v580_v56 = vpop.f32.mrf.mxu0 }
 0x3b3   :  { %v1594_v44 = vadd.f32 %v1588_v38, %v580_v56  ;;  %v678_v56 = vpop.permute.xlu2 %677 }
 0x3b5   :  { %v700_v51 = vmul.f32 %v623_v3, %v1594_v44 }
 0x3b7   :  { %v737_v62 = vmul.f32 %v700_v51, %v700_v51 }
 0x3ba   :  { %v582_v57 = vpop.f32.mrf.mxu0 }
 0x3bb   :  { %v1591_v42 = vadd.f32 %v1588_v38, %v582_v57 }
 0x3bd   :  { %v701_v48 = vmul.f32 %v628_v43, %v1591_v42 }
 0x3bf   :  { %v738_v54 = vmul.f32 %v701_v48, %v701_v48  ;;  %v716_v8 = vadd.f32 %v701_v48, %v700_v51  ;;  %v1272_v48 = vld [vmem:[%s1779_s4 + $0xf8] sm:$0xff] }
 0x3c0   :  { %949 = vmatpush.bf16.msrb.mxu1 %v1272_v48 }
 0x3c1   :  { %v753_v10 = vadd.f32 %v738_v54, %v737_v62 }
 0x3c2   :  { %v585_v58 = vpop.f32.mrf.mxu0 }
 0x3c3   :  { %v1597_v45 = vadd.f32 %v1588_v38, %v585_v58 }
 0x3c5   :  { %v702_v52 = vmul.f32 %v633_v39, %v1597_v45 }
 0x3c7   :  { %v739_v0 = vmul.f32 %v702_v52, %v702_v52  ;;  %v717_v15 = vadd.f32 %v716_v8, %v702_v52 }
 0x3c9   :  { %v754_v16 = vadd.f32 %v753_v10, %v739_v0 }
 0x3ca   :  { %v587_v59 = vpop.f32.mrf.mxu0 }
 0x3cb   :  { %v1601_v49 = vadd.f32 %v1588_v38, %v587_v59 }
 0x3cd   :  { %v703_v55 = vmul.f32 %v638_v46, %v1601_v49  ;;  %v683_v46 = vpop.permute.xlu0 %682 }
 0x3cf   :  { %v740_v11 = vmul.f32 %v703_v55, %v703_v55  ;;  %v718_v20 = vadd.f32 %v717_v15, %v703_v55  ;;  %v688_v55 = vpop.permute.xlu1 %687 }
 0x3d1   :  { %v755_v21 = vadd.f32 %v754_v16, %v740_v11 }
 0x3d2   :  { %v590_v63 = vpop.f32.mrf.mxu0 }
 0x3d3   :  { %v1606_v53 = vadd.f32 %v1588_v38, %v590_v63 }
 0x3d5   :  { %v704_v4 = vmul.f32 %v643_v40, %v1606_v53 }
 0x3d7   :  { %v741_v17 = vmul.f32 %v704_v4, %v704_v4  ;;  %v719_v9 = vadd.f32 %v718_v20, %v704_v4 }
 0x3d9   :  { %v756_v26 = vadd.f32 %v755_v21, %v741_v17 }
 0x3da   :  { %v592_v2 = vpop.f32.mrf.mxu0 }
 0x3db   :  { %v1610_v60 = vadd.f32 %v1588_v38, %v592_v2 }
 0x3dd   :  { %v705_v12 = vmul.f32 %v648_v50, %v1610_v60 }
 0x3df   :  { %v742_v22 = vmul.f32 %v705_v12, %v705_v12  ;;  %v720_v31 = vadd.f32 %v719_v9, %v705_v12 }
 0x3e1   :  { %v757_v33 = vadd.f32 %v756_v26, %v742_v22 }
 0x3e2   :  { %v595_v35 = vpop.f32.mrf.mxu0 }
 0x3e3   :  { %v1614_v5 = vadd.f32 %v1588_v38, %v595_v35 }
 0x3e5   :  { %v706_v18 = vmul.f32 %v653_v61, %v1614_v5 }
 0x3e7   :  { %v743_v27 = vmul.f32 %v706_v18, %v706_v18  ;;  %v721_v57 = vadd.f32 %v720_v31, %v706_v18  ;;  %v1270_v18 = vld [vmem:[%s1779_s4 + $0xe8] sm:$0xff] }
 0x3e9   :  { %v758_v63 = vadd.f32 %v757_v33, %v743_v27 }
 0x3ea   :  { %v597_v1 = vpop.f32.mrf.mxu0 }
 0x3eb   :  { %v1618_v13 = vadd.f32 %v1588_v38, %v597_v1 }
 0x3ed   :  { %v707_v23 = vmul.f32 %v658_v6, %v1618_v13  ;;  %v693_v6 = vpop.permute.xlu2 %692 }
 0x3ef   :  { %v744_v34 = vmul.f32 %v707_v23, %v707_v23  ;;  %v722_v35 = vadd.f32 %v721_v57, %v707_v23 }
 0x3f2   :  { %v600_v36 = vpop.f32.mrf.mxu0 }
 0x3f3   :  { %v1622_v19 = vadd.f32 %v1588_v38, %v600_v36 }
 0x3f5   :  { %v708_v28 = vmul.f32 %v663_v14, %v1622_v19 }
 0x3f7   :  { %v745_v2 = vmul.f32 %v708_v28, %v708_v28  ;;  %v723_v3 = vadd.f32 %v722_v35, %v708_v28  ;;  %v1269_v28 = vld [vmem:[%s1779_s4 + $0xe0] sm:$0xff] }
 0x3fa   :  { %v602_v37 = vpop.f32.mrf.mxu0 }
 0x3fb   :  { %v1626_v25 = vadd.f32 %v1588_v38, %v602_v37  ;;  %v759_v37 = vadd.f32 %v758_v63, %v744_v34 }
 0x3fd   :  { %v709_v58 = vmul.f32 %v668_v24, %v1626_v25  ;;  %v760_v43 = vadd.f32 %v759_v37, %v745_v2  ;;  %v698_v24 = vpop.permute.xlu0 %697  ;;  %v1267_v2 = vld [vmem:[%s1779_s4 + $0xd0] sm:$0xff] }
 0x3ff   :  { %v746_v39 = vmul.f32 %v709_v58, %v709_v58  ;;  %v724_v50 = vadd.f32 %v723_v3, %v709_v58 }
 0x401   :  { %v761_v61 = vadd.f32 %v760_v43, %v746_v39  ;;  %v1266_v39 = vld [vmem:[%s1779_s4 + $0xc8] sm:$0xff] }
 0x402   :  { %v605_v41 = vpop.f32.mrf.mxu0 }
 0x403   :  { %v1630_v32 = vadd.f32 %v1588_v38, %v605_v41 }
 0x405   :  { %v710_v1 = vmul.f32 %v673_v29, %v1630_v32 }
 0x407   :  { %v747_v51 = vmul.f32 %v710_v1, %v710_v1  ;;  %v725_v62 = vadd.f32 %v724_v50, %v710_v1 }
 0x409   :  { %v762_v8 = vadd.f32 %v761_v61, %v747_v51 }
 0x40a   :  { %v607_v47 = vpop.f32.mrf.mxu0 }
 0x40b   :  { %v1634_v59 = vadd.f32 %v1588_v38, %v607_v47 }
 0x40d   :  { %v711_v40 = vmul.f32 %v678_v56, %v1634_v59  ;;  %v1268_v56 = vld [vmem:[%s1779_s4 + $0xd8] sm:$0xff] }
 0x40f   :  { %v748_v0 = vmul.f32 %v711_v40, %v711_v40  ;;  %v726_v10 = vadd.f32 %v725_v62, %v711_v40 }
 0x411   :  { %v763_v14 = vadd.f32 %v762_v8, %v748_v0 }
 0x412   :  { %v610_v7 = vpop.f32.mrf.mxu0 }
 0x413   :  { %v1638_v36 = vadd.f32 %v1588_v38, %v610_v7  ;;  %v1271_v7 = vld [vmem:[%s1779_s4 + $0xf0] sm:$0xff] }
 0x414   :  { %950 = vmatpush.bf16.msrb.mxu1 %v1271_v7 }
 0x415   :  { %v712_v52 = vmul.f32 %v683_v46, %v1638_v36  ;;  %v1265_v46 = vld [vmem:[%s1779_s4 + $0xc0] sm:$0xff] }
 0x417   :  { %v749_v11 = vmul.f32 %v712_v52, %v712_v52  ;;  %v727_v15 = vadd.f32 %v726_v10, %v712_v52 }
 0x418   :  { %951 = vmatpush.bf16.msrb.mxu1 %v1270_v18 }
 0x419   :  { %v764_v20 = vadd.f32 %v763_v14, %v749_v11 }
 0x41a   :  { %v612_v30 = vpop.f32.mrf.mxu0 }
 0x41b   :  { %v1642_v41 = vadd.f32 %v1588_v38, %v612_v30 }
 0x41c   :  { %952 = vmatpush.bf16.msrb.mxu1 %v1269_v28 }
 0x41d   :  { %v713_v4 = vmul.f32 %v688_v55, %v1642_v41 }
 0x41f   :  { %v750_v16 = vmul.f32 %v713_v4, %v713_v4  ;;  %v728_v21 = vadd.f32 %v727_v15, %v713_v4 }
 0x420   :  { %953 = vmatpush.bf16.msrb.mxu1 %v1268_v56 }
 0x421   :  { %v765_v9 = vadd.f32 %v764_v20, %v750_v16  ;;  %v1707_v20 = vld [vmem:[%s1781_s5 + $0x5] ss:$0 sm:$0xff] }
 0x422   :  { %v615_v47 = vpop.f32.mrf.mxu0 }
 0x423   :  { %v1649_v54 = vadd.f32 %v1588_v38, %v615_v47 }
 0x424   :  { %954 = vmatpush.bf16.msrb.mxu1 %v1267_v2 }
 0x425   :  { %v714_v12 = vmul.f32 %v693_v6, %v1649_v54 }
 0x427   :  { %v751_v22 = vmul.f32 %v714_v12, %v714_v12  ;;  %v729_v26 = vadd.f32 %v728_v21, %v714_v12 }
 0x428   :  { %955 = vmatpush.bf16.msrb.mxu1 %v1266_v39 }
 0x429   :  { %v766_v29 = vadd.f32 %v765_v9, %v751_v22 }
 0x42a   :  { %v617_v17 = vpop.f32.mrf.mxu0 }
 0x42b   :  { %v618_v23 = vadd.f32 %v1588_v38, %v617_v17 }
 0x42c   :  { %956 = vmatpush.bf16.msrb.mxu1 %v1265_v46 }
 0x42d   :  { %v715_v27 = vmul.f32 %v698_v24, %v618_v23 }
 0x42f   :  { %v730_v30 = vadd.f32 %v729_v26, %v715_v27  ;;  %v752_v31 = vmul.f32 %v715_v27, %v715_v27 }
 0x431   :  { %v731_v33 = vrot.slane %v730_v30, 4  ;;  %v767_v34 = vadd.f32 %v766_v29, %v752_v31 }
 0x433   :  { %v732_v38 = vadd.f32 %v731_v33, %v730_v30  ;;  %v768_v57 = vrot.slane %v767_v34, 4 }
 0x435   :  { %v733_v58 = vrot.slane %v732_v38, 2  ;;  %v769_v63 = vadd.f32 %v768_v57, %v767_v34 }
 0x437   :  { %v734_v35 = vadd.f32 %v733_v58, %v732_v38  ;;  %v770_v1 = vrot.slane %v769_v63, 2 }
 0x439   :  { %v735_v37 = vrot.slane %v734_v35, 1  ;;  %v771_v3 = vadd.f32 %v770_v1, %v769_v63 }
 0x43b   :  { %v736_v40 = vadd.f32 %v735_v37, %v734_v35  ;;  %v772_v43 = vrot.slane %v771_v3, 1 }
 0x43d   :  { %v773_v47 = vadd.f32 %v772_v43, %v771_v3  ;;  %v1675_v48 = vmul.f32 0.03125, %v736_v40 }
 0x43f   :  { %v775_v50 = vmul.f32 0.03125, %v773_v47  ;;  %v776_v51 = vmul.f32 %v1675_v48, %v1675_v48  ;;  %v794_v52 = vsub.f32 %v618_v23, %v1675_v48  ;;  %v789_v61 = vsub.f32 %v1630_v32, %v1675_v48 }
 0x440   :  { %v790_v62 = vsub.f32 %v1634_v59, %v1675_v48  ;;  %v791_v4 = vsub.f32 %v1638_v36, %v1675_v48  ;;  %v792_v6 = vsub.f32 %v1642_v41, %v1675_v48  ;;  %v793_v7 = vsub.f32 %v1649_v54, %v1675_v48  ;;  %v1693_v59 = vld [vmem:[%s1781_s5 + $0x4] ss:$0 sm:$0xff] }
 0x441   :  { %v777_v55 = vsub.f32 %v775_v50, %v776_v51  ;;  %v779_v36 = vsub.f32 %v1594_v44, %v1675_v48  ;;  %v780_v41 = vsub.f32 %v1591_v42, %v1675_v48  ;;  %v781_v21 = vsub.f32 %v1597_v45, %v1675_v48 }
 0x442   :  { %v782_v23 = vsub.f32 %v1601_v49, %v1675_v48  ;;  %v787_v45 = vsub.f32 %v1622_v19, %v1675_v48  ;;  %v788_v30 = vsub.f32 %v1626_v25, %v1675_v48 }
 0x443   :  { %v778_v0 = vmax.f32 %v777_v55, 0.0 }
 0x445   :  { %v795_v8 = vadd.f32 1e-05, %v778_v0 }
 0x447   :  { %1299 = vrsqrt.f32 %v795_v8  ;;  %vm802_vm1 = vweird.f32 %v795_v8 }
 0x44d   :  { %v1300_v10 = vpop.eup %1299 }
 0x44e   :  { %v797_v11 = vmul.f32 %v1300_v10, %v795_v8  ;;  %vm803_vm0 = vweird.f32 %v1300_v10 }
 0x44f   :  { %vm804_vm2 = vmor %vm802_vm1, %vm803_vm0 }
 0x450   :  { %v798_v12 = vmul.f32 %v1300_v10, %v797_v11 }
 0x452   :  { %v799_v14 = vmul.f32 0.5, %v798_v12 }
 0x454   :  { %v800_v32 = vsub.f32 1.5, %v799_v14 }
 0x456   :  { %v801_v15 = vmul.f32 %v1300_v10, %v800_v32 }
 0x458   :  { %v1699_v54 = vsel %vm804_vm2, %v1300_v10, %v801_v15 }
 0x459   :  { %v821_v16 = vmul.f32 %v1699_v54, %v794_v52  ;;  %v806_v17 = vmul.f32 %v1699_v54, %v779_v36  ;;  %v807_v18 = vmul.f32 %v1699_v54, %v780_v41  ;;  %v808_v24 = vmul.f32 %v1699_v54, %v781_v21 }
 0x45a   :  { %v809_v27 = vmul.f32 %v1699_v54, %v782_v23  ;;  %v814_v49 = vmul.f32 %v1699_v54, %v787_v45  ;;  %v815_v34 = vmul.f32 %v1699_v54, %v788_v30  ;;  %v816_v38 = vmul.f32 %v1699_v54, %v789_v61 }
 0x45b   :  { %v839_v44 = vmul.f32 %v1693_v59, %v821_v16  ;;  %v824_v42 = vmul.f32 %v1693_v59, %v806_v17  ;;  %v825_v22 = vmul.f32 %v1693_v59, %v807_v18  ;;  %v826_v31 = vmul.f32 %v1693_v59, %v808_v24 }
 0x45c   :  { %v827_v56 = vmul.f32 %v1693_v59, %v809_v27  ;;  %v832_v57 = vmul.f32 %v1693_v59, %v814_v49  ;;  %v833_v58 = vmul.f32 %v1693_v59, %v815_v34  ;;  %v817_v19 = vmul.f32 %v1699_v54, %v790_v62 }
 0x45d   :  { %v842_v9 = vadd.f32 %v1707_v20, %v824_v42  ;;  %v843_v26 = vadd.f32 %v1707_v20, %v825_v22  ;;  %v818_v25 = vmul.f32 %v1699_v54, %v791_v4  ;;  %v844_v63 = vadd.f32 %v1707_v20, %v826_v31 }
 0x45e   :  { %v834_v2 = vmul.f32 %v1693_v59, %v816_v38  ;;  %v819_v35 = vmul.f32 %v1699_v54, %v792_v6  ;;  %v820_v1 = vmul.f32 %v1699_v54, %v793_v7  ;;  %v850_v37 = vadd.f32 %v1707_v20, %v832_v57 }
 0x45f   :  { %v858_v28 = vmax.f32 %v842_v9, 0.0  ;;  %v859_v29 = vmax.f32 %v843_v26, 0.0  ;;  %v851_v3 = vadd.f32 %v1707_v20, %v833_v58  ;;  %v835_v39 = vmul.f32 %v1693_v59, %v817_v19 }
 0x460   :  { %v836_v40 = vmul.f32 %v1693_v59, %v818_v25  ;;  %v852_v43 = vadd.f32 %v1707_v20, %v834_v2  ;;  %v837_v46 = vmul.f32 %v1693_v59, %v819_v35  ;;  %v838_v47 = vmul.f32 %v1693_v59, %v820_v1 }
 0x461   :  { %v874_v33 = vpack.c.bf16 %v859_v29, %v858_v28  ;;  %v857_v50 = vadd.f32 %v1707_v20, %v839_v44  ;;  %v866_v51 = vmax.f32 %v850_v37, 0.0  ;;  %v867_v52 = vmax.f32 %v851_v3, 0.0 }
 0x462   :  { %v853_v55 = vadd.f32 %v1707_v20, %v835_v39  ;;  %v854_v61 = vadd.f32 %v1707_v20, %v836_v40  ;;  %v868_v62 = vmax.f32 %v852_v43, 0.0  ;;  %v855_v0 = vadd.f32 %v1707_v20, %v837_v46 }
 0x463   :  { %957 = vmatmul.bf16.vlgmr.msrb.gmra.mxu1 %v874_v33  ;;  %v856_v4 = vadd.f32 %v1707_v20, %v838_v47  ;;  %v873_v6 = vmax.f32 %v857_v50, 0.0  ;;  %v845_v7 = vadd.f32 %v1707_v20, %v827_v56  ;;  %v878_v8 = vpack.c.bf16 %v867_v52, %v866_v51 }
 0x464   :  { %v869_v10 = vmax.f32 %v853_v55, 0.0  ;;  %v870_v11 = vmax.f32 %v854_v61, 0.0  ;;  %v871_v12 = vmax.f32 %v855_v0, 0.0  ;;  %v860_v41 = vmax.f32 %v844_v63, 0.0 }
 0x465   :  { %v872_v14 = vmax.f32 %v856_v4, 0.0  ;;  %v861_v16 = vmax.f32 %v845_v7, 0.0  ;;  %v783_v17 = vsub.f32 %v1606_v53, %v1675_v48  ;;  %v784_v18 = vsub.f32 %v1610_v60, %v1675_v48 }
 0x466   :  { %v879_v32 = vpack.c.bf16 %v869_v10, %v868_v62  ;;  %v880_v15 = vpack.c.bf16 %v871_v12, %v870_v11  ;;  %v785_v53 = vsub.f32 %v1614_v5, %v1675_v48  ;;  %v786_v60 = vsub.f32 %v1618_v13, %v1675_v48  ;;  %v1298_v48 = vld [vmem:[%s1781_s5 + $0x3] ss:$0 sm:$0xff] }
 0x467   :  { %v881_v36 = vpack.c.bf16 %v873_v6, %v872_v14  ;;  %v875_v21 = vpack.c.bf16 %v861_v16, %v860_v41  ;;  %v810_v44 = vmul.f32 %v1699_v54, %v783_v17  ;;  %v811_v42 = vmul.f32 %v1699_v54, %v784_v18  ;;  %v998_v17 = vld [vmem:[%s1784_s2] sm:$0xf] }
 0x468   :  { %v812_v29 = vmul.f32 %v1699_v54, %v785_v53  ;;  %v813_v45 = vmul.f32 %v1699_v54, %v786_v60 }
 0x469   :  { %v828_v22 = vmul.f32 %v1693_v59, %v810_v44  ;;  %v829_v23 = vmul.f32 %v1693_v59, %v811_v42 }
 0x46a   :  { %v830_v30 = vmul.f32 %v1693_v59, %v812_v29  ;;  %v831_v31 = vmul.f32 %v1693_v59, %v813_v45 }
 0x46b   :  { %v846_v24 = vadd.f32 %v1707_v20, %v828_v22  ;;  %v847_v9 = vadd.f32 %v1707_v20, %v829_v23 }
 0x46c   :  { %v848_v33 = vadd.f32 %v1707_v20, %v830_v30  ;;  %v849_v49 = vadd.f32 %v1707_v20, %v831_v31 }
 0x46d   :  { %v862_v26 = vmax.f32 %v846_v24, 0.0  ;;  %v863_v27 = vmax.f32 %v847_v9, 0.0 }
 0x46e   :  { %v864_v34 = vmax.f32 %v848_v33, 0.0  ;;  %v865_v56 = vmax.f32 %v849_v49, 0.0 }
 0x46f   :  { %v876_v28 = vpack.c.bf16 %v863_v27, %v862_v26 }
 0x470   :  { %v877_v5 = vpack.c.bf16 %v865_v56, %v864_v34 }
 0x473   :  { %962 = vmatmul.bf16.gmra.mxu1 %v875_v21 }
 0x483   :  { %967 = vmatmul.bf16.gmra.mxu1 %v876_v28 }
 0x493   :  { %972 = vmatmul.bf16.gmra.mxu1 %v877_v5 }
 0x4a3   :  { %977 = vmatmul.bf16.gmra.mxu1 %v878_v8 }
 0x4b3   :  { %982 = vmatmul.bf16.gmra.mxu1 %v879_v32 }
 0x4c3   :  { %987 = vmatmul.bf16.gmra.mxu1 %v880_v15 }
 0x4d3   :  { %992 = vmatmul.bf16.gmra.mxu1 %v881_v36 }
 0x4e0   :  { %v958_v13 = vpop.f32.mrf.mxu1 }
 0x4e1   :  { %v959_v38 = vadd.f32 %v1298_v48, %v958_v13 }
 0x4e8   :  { %v960_v54 = vpop.f32.mrf.mxu1 }
 0x4e9   :  { %v961_v59 = vadd.f32 %v1298_v48, %v960_v54 }
 0x4eb   :  { %v999_v57 = vpack.c.bf16 %v961_v59, %v959_v38 }
 0x4f0   :  { %v963_v58 = vpop.f32.mrf.mxu1 }
 0x4f1   :  { %v964_v20 = vadd.f32 %v1298_v48, %v963_v58 }
 0x4f8   :  { %v965_v19 = vpop.f32.mrf.mxu1 }
 0x4f9   :  { %v966_v25 = vadd.f32 %v1298_v48, %v965_v19 }
 0x4fb   :  { %v1000_v63 = vpack.c.bf16 %v966_v25, %v964_v20 }
 0x500   :  { %v968_v2 = vpop.f32.mrf.mxu1 }
 0x501   :  { %v969_v1 = vadd.f32 %v1298_v48, %v968_v2 }
 0x508   :  { %v970_v35 = vpop.f32.mrf.mxu1 }
 0x509   :  { %v971_v37 = vadd.f32 %v1298_v48, %v970_v35 }
 0x50b   :  { %v1001_v3 = vpack.c.bf16 %v971_v37, %v969_v1 }
 0x510   :  { %v973_v39 = vpop.f32.mrf.mxu1 }
 0x511   :  { %v974_v43 = vadd.f32 %v1298_v48, %v973_v39 }
 0x518   :  { %v975_v40 = vpop.f32.mrf.mxu1 }
 0x519   :  { %v976_v46 = vadd.f32 %v1298_v48, %v975_v40 }
 0x51b   :  { %v1002_v47 = vpack.c.bf16 %v976_v46, %v974_v43 }
 0x520   :  { %v978_v50 = vpop.f32.mrf.mxu1 }
 0x521   :  { %v979_v41 = vadd.f32 %v1298_v48, %v978_v50 }
 0x528   :  { %v980_v51 = vpop.f32.mrf.mxu1 }
 0x529   :  { %v981_v15 = vadd.f32 %v1298_v48, %v980_v51 }
 0x52b   :  { %v1003_v16 = vpack.c.bf16 %v981_v15, %v979_v41 }
 0x530   :  { %v983_v52 = vpop.f32.mrf.mxu1 }
 0x531   :  { %v984_v32 = vadd.f32 %v1298_v48, %v983_v52 }
 0x538   :  { %v985_v55 = vpop.f32.mrf.mxu1 }
 0x539   :  { %v986_v12 = vadd.f32 %v1298_v48, %v985_v55 }
 0x53b   :  { %v1004_v36 = vpack.c.bf16 %v986_v12, %v984_v32 }
 0x540   :  { %v988_v61 = vpop.f32.mrf.mxu1 }
 0x541   :  { %v989_v11 = vadd.f32 %v1298_v48, %v988_v61 }
 0x548   :  { %v990_v62 = vpop.f32.mrf.mxu1 }
 0x549   :  { %v991_v8 = vadd.f32 %v1298_v48, %v990_v62 }
 0x54b   :  { %v1005_v14 = vpack.c.bf16 %v991_v8, %v989_v11 }
 0x550   :  { %v993_v0 = vpop.f32.mrf.mxu1 }
 0x551   :  { %v994_v6 = vadd.f32 %v1298_v48, %v993_v0 }
 0x558   :  { %v995_v4 = vpop.f32.mrf.mxu1 }
 0x559   :  { %v996_v7 = vadd.f32 %v1298_v48, %v995_v4 }
 0x55b   :  { %v1006_v10 = vpack.c.bf16 %v996_v7, %v994_v6 }
 0x55d   :  { %1007 = vmatpush.bf16.msra.mxu2 %v1006_v10 }
 0x561   :  { %1008 = vmatpush.bf16.msra.mxu2 %v1005_v14 }
 0x565   :  { %1009 = vmatpush.bf16.msra.mxu2 %v1004_v36 }
 0x569   :  { %1010 = vmatpush.bf16.msra.mxu2 %v1003_v16 }
 0x56d   :  { %1011 = vmatpush.bf16.msra.mxu2 %v1002_v47 }
 0x571   :  { %1012 = vmatpush.bf16.msra.mxu2 %v1001_v3 }
 0x575   :  { %1013 = vmatpush.bf16.msra.mxu2 %v1000_v63 }
 0x579   :  { %1014 = vmatpush.bf16.msra.mxu2 %v999_v57 }
 0x57c   :  { %1015 = vmatmul.bf16.vlgmr.msra.gmra.mxu2 %v998_v17 }
 0x5ff   :  { %v1016_v18 = vpop.f32.mrf.mxu2 }
 0x600   :  { %1020 = vst [vmem:[%s1785_s6] sm:$0xff] %v1016_v18 }
 0x607   :  { %v1018_v21 = vpop.f32.mrf.mxu2 }

</bundles_post_ra>
